<compile_context>
chip_gen: v7x
topology: tpu7x:2x2x1
jax: 0.10.0
libtpu: 0.0.40
codegen_flags: <defaults>
</compile_context>

<pallas_src>
import functools

import jax
import jax.numpy as jnp
from jax.experimental import pallas as pl
from jax.experimental.pallas import tpu as pltpu


def _round_up(x: int, m: int) -> int:
    return (x + m - 1) // m * m


def _pick_block_k(n_pad: int, d_pad: int) -> int:
    """Feature-axis block size: lane-dense, and 2x-buffered tiles <= ~8 MiB."""
    budget_elems = (8 * 1024 * 1024) // (2 * 4)          # f32, double-buffered
    max_k = max(128, (budget_elems // n_pad) // 128 * 128)
    return min(d_pad, max_k, 1024)


def _triplet_kernel(x_ref, tcol_ref, trow_ref, loss_ref, correct_ref, gram_ref,
                    *, n_valid: int, margin: float):
    """Grid axis 0 tiles the feature dimension; gram_ref accumulates x @ x^T."""
    k = pl.program_id(0)
    nk = pl.num_programs(0)

    @pl.when(k == 0)
    def _():
        gram_ref[...] = jnp.zeros_like(gram_ref)

    x = x_ref[...].astype(jnp.float32)                       # (n_pad, block_k)
    gram_ref[...] += jax.lax.dot_general(
        x, x, (((1,), (1,)), ((), ())),                      # x @ x^T (contract feat dim)
        preferred_element_type=jnp.float32,
        precision=jax.lax.Precision.HIGHEST)

    @pl.when(k == nk - 1)
    def _():
        g = gram_ref[...]                                    # (n_pad, n_pad)
        n_pad = g.shape[0]

        row_idx = jax.lax.broadcasted_iota(jnp.int32, (n_pad, n_pad), 0)
        col_idx = jax.lax.broadcasted_iota(jnp.int32, (n_pad, n_pad), 1)

        # Squared norms = diagonal of the Gram matrix (no extra pass over x).
        diag = jnp.where(row_idx == col_idx, g, 0.0)
        sq_col = jnp.sum(diag, axis=1, keepdims=True)        # (n_pad, 1)
        sq_row = jnp.sum(diag, axis=0, keepdims=True)        # (1, n_pad)

        dist2 = sq_col + sq_row - 2.0 * g
        dist = jnp.sqrt(jnp.maximum(dist2, 1e-12))

        # Label mask (same identity) + validity masks for padded rows/cols.
        same = tcol_ref[...] == trow_ref[...]                # (n_pad, n_pad) bool
        col_valid = col_idx < n_valid
        pos_mask = jnp.logical_and(same, col_valid)
        neg_mask = jnp.logical_and(jnp.logical_not(same), col_valid)

        big = jnp.float32(1e30)
        dist_ap = jnp.max(jnp.where(pos_mask, dist, -big), axis=1, keepdims=True)
        dist_an = jnp.min(jnp.where(neg_mask, dist, big), axis=1, keepdims=True)

        rv = jax.lax.broadcasted_iota(jnp.int32, (n_pad, 1), 0) < n_valid  # valid rows

        # MarginRankingLoss(margin), y = 1: mean(relu(dist_ap - dist_an + margin)).
        hinge = jnp.maximum(dist_ap - dist_an + jnp.float32(margin), 0.0)
        loss = jnp.sum(jnp.where(rv, hinge, 0.0)) * jnp.float32(1.0 / n_valid)

        # correct = sum(dist_an >= dist_ap) over the real batch.
        correct = jnp.sum(
            jnp.where(jnp.logical_and(rv, dist_an >= dist_ap), 1.0, 0.0))

        loss_ref[0, 0] = loss
        correct_ref[0, 0] = correct.astype(jnp.int32)


def ori_triplet_loss(inputs, targets, margin: float = 0.3):
    """Pallas forward of OriTripletLoss. Returns (loss, correct_count)."""
    n, d = inputs.shape
    assert targets.shape == (n,), "targets must be shape (batch_size,)"

    n_pad = _round_up(max(n, 8), 8)
    d_pad = _round_up(d, 128)
    block_k = _pick_block_k(n_pad, d_pad)
    d_pad = _round_up(d_pad, block_k)

    # Zero-pad features; padded labels get a sentinel (-1) and are additionally
    # masked out inside the kernel via iota validity masks.
    x = jnp.pad(inputs.astype(jnp.float32), ((0, n_pad - n), (0, d_pad - d)))
    t = jnp.pad(targets.astype(jnp.int32), (0, n_pad - n), constant_values=-1)
    t_col = t.reshape(n_pad, 1)
    t_row = t.reshape(1, n_pad)

    kernel = functools.partial(_triplet_kernel, n_valid=n, margin=float(margin))

    loss, correct = pl.pallas_call(
        kernel,
        grid=(d_pad // block_k,),
        in_specs=[
            pl.BlockSpec((n_pad, block_k), lambda k: (0, k)),
            pl.BlockSpec((n_pad, 1), lambda k: (0, 0)),
            pl.BlockSpec((1, n_pad), lambda k: (0, 0)),
        ],
        out_specs=[
            pl.BlockSpec((1, 1), lambda k: (0, 0),
                         memory_space=pltpu.MemorySpace.SMEM),
            pl.BlockSpec((1, 1), lambda k: (0, 0),
                         memory_space=pltpu.MemorySpace.SMEM),
        ],
        out_shape=[
            jax.ShapeDtypeStruct((1, 1), jnp.float32),
            jax.ShapeDtypeStruct((1, 1), jnp.int32),
        ],
        scratch_shapes=[pltpu.VMEM((n_pad, n_pad), jnp.float32)],
        compiler_params=pltpu.CompilerParams(
            dimension_semantics=("arbitrary",)),
    )(x, t_col, t_row)

    return loss[0, 0], correct[0, 0]


def _reference_ori_triplet_loss(inputs, targets, margin: float = 0.3):
    """Pure-JAX reference mirroring the PyTorch OriTripletLoss.forward."""
    sq = jnp.sum(inputs * inputs, axis=1, keepdims=True)
    dist = sq + sq.T - 2.0 * jnp.dot(inputs, inputs.T,
                                     precision=jax.lax.Precision.HIGHEST)
    dist = jnp.sqrt(jnp.maximum(dist, 1e-12))
    mask = targets[:, None] == targets[None, :]
    dist_ap = jnp.max(jnp.where(mask, dist, -jnp.inf), axis=1)
    dist_an = jnp.min(jnp.where(mask, jnp.inf, dist), axis=1)
    loss = jnp.mean(jnp.maximum(dist_ap - dist_an + margin, 0.0))
    correct = jnp.sum((dist_an >= dist_ap).astype(jnp.int32))
    return loss, correct


if __name__ == "__main__":
    key = jax.random.PRNGKey(0)
    k1, _ = jax.random.split(key)

    # Typical P x K re-id sampling at small scale: 4 identities x 2 instances,
    # 32-dim embeddings. (Batches where some row has no negative are undefined
    # in the PyTorch reference as well.)
    batch, feat_dim = 8, 32
    inputs = jax.random.normal(k1, (batch, feat_dim), dtype=jnp.float32)
    targets = jnp.array([0, 0, 1, 1, 2, 2, 3, 3], dtype=jnp.int32)

    loss, correct = ori_triplet_loss(inputs, targets, margin=0.3)
    jax.block_until_ready((loss, correct))

    ref_loss, ref_correct = _reference_ori_triplet_loss(inputs, targets, margin=0.3)

    assert jnp.allclose(loss, ref_loss, rtol=1e-5, atol=1e-6), (loss, ref_loss)
    assert int(correct) == int(ref_correct), (int(correct), int(ref_correct))

    print("KERNEL_OK")
</pallas_src>

<mosaic_0001>
module attributes {stable_mosaic.version = 11 : i64} {
  func.func @_triplet_kernel(%arg0: i32, %arg1: memref<8x128xf32, #tpu.memory_space<vmem>>, %arg2: memref<8x1xi32, #tpu.memory_space<vmem>>, %arg3: memref<1x8xi32, #tpu.memory_space<vmem>>, %arg4: memref<1x1xf32, #tpu.memory_space<smem>>, %arg5: memref<1x1xi32, #tpu.memory_space<smem>>, %arg6: memref<8x8xf32, #tpu.memory_space<vmem>>) attributes {dimension_semantics = [#tpu.dimension_semantics<arbitrary>], iteration_bounds = array<i64: 1>, scalar_prefetch = 0 : i64, scratch_operands = 1 : i64, tpu.core_type = #tpu.core_type<tc>, window_params = [{transform_indices = @transform_0, window_bounds = array<i64: 8, 128>}, {pipeline_mode = #tpu.pipeline_mode<synchronous>, transform_indices = @transform_1, window_bounds = array<i64: 8, 1>}, {pipeline_mode = #tpu.pipeline_mode<synchronous>, transform_indices = @transform_2, window_bounds = array<i64: 1, 8>}, {transform_indices = @transform_3, window_bounds = array<i64: 1, 1>}, {transform_indices = @transform_4, window_bounds = array<i64: 1, 1>}]} {
    %c0_i32 = arith.constant 0 : i32
    %0 = arith.cmpi eq, %arg0, %c0_i32 : i32
    %1 = arith.extui %0 : i1 to i32
    %c0_i32_0 = arith.constant 0 : i32
    %2 = arith.cmpi ne, %1, %c0_i32_0 : i32
    scf.if %2 {
      %cst_8 = arith.constant 0.000000e+00 : f32
      %11 = vector.broadcast %cst_8 : f32 to vector<8x8xf32>
      %c0_9 = arith.constant 0 : index
      %c0_10 = arith.constant 0 : index
      %12 = vector.load %arg6[%c0_9, %c0_10] : memref<8x8xf32, #tpu.memory_space<vmem>>, vector<8x8xf32>
      tpu.vector_store %arg6[%c0_9, %c0_10], %11 {strides = array<i32>} : memref<8x8xf32, #tpu.memory_space<vmem>>, vector<8x8xf32>,
    } else {
    }
    %c0 = arith.constant 0 : index
    %c0_1 = arith.constant 0 : index
    %3 = vector.load %arg1[%c0, %c0_1] : memref<8x128xf32, #tpu.memory_space<vmem>>, vector<8x128xf32>
    %c0_2 = arith.constant 0 : index
    %c0_3 = arith.constant 0 : index
    %4 = vector.load %arg6[%c0_2, %c0_3] : memref<8x8xf32, #tpu.memory_space<vmem>>, vector<8x8xf32>
    %cst = arith.constant dense<0.000000e+00> : vector<8x8xf32>
    %5 = tpu.matmul %3, %3, %cst {dimension_numbers = #tpu.dot_dimension_numbers<[1], [1], [0], [0], [0, 0, 1, 0], [], []>, precision = #tpu.contract_precision<fp32>} : vector<8x128xf32>, vector<8x128xf32>, vector<8x8xf32> -> vector<8x8xf32>
    %6 = arith.addf %4, %5 : vector<8x8xf32>
    %c0_4 = arith.constant 0 : index
    %c0_5 = arith.constant 0 : index
    %7 = vector.load %arg6[%c0_4, %c0_5] : memref<8x8xf32, #tpu.memory_space<vmem>>, vector<8x8xf32>
    tpu.vector_store %arg6[%c0_4, %c0_5], %6 {strides = array<i32>} : memref<8x8xf32, #tpu.memory_space<vmem>>, vector<8x8xf32>,
    %c0_i32_6 = arith.constant 0 : i32
    %8 = arith.cmpi eq, %arg0, %c0_i32_6 : i32
    %9 = arith.extui %8 : i1 to i32
    %c0_i32_7 = arith.constant 0 : i32
    %10 = arith.cmpi ne, %9, %c0_i32_7 : i32
    scf.if %10 {
      %c0_8 = arith.constant 0 : index
      %c0_9 = arith.constant 0 : index
      %11 = vector.load %arg6[%c0_8, %c0_9] : memref<8x8xf32, #tpu.memory_space<vmem>>, vector<8x8xf32>
      %12 = tpu.iota {dimensions = array<i32: 0>} : vector<8x8xi32>
      %13 = tpu.iota {dimensions = array<i32: 1>} : vector<8x8xi32>
      %14 = arith.cmpi eq, %12, %13 : vector<8x8xi32>
      %cst_10 = arith.constant 0.000000e+00 : f32
      %15 = vector.broadcast %cst_10 : f32 to vector<8x8xf32>
      %16 = arith.select %14, %11, %15 : vector<8x8xi1>, vector<8x8xf32>
      %cst_11 = arith.constant dense<0.000000e+00> : vector<8xf32>
      %17 = vector.multi_reduction <add>, %16, %cst_11 [1] : vector<8x8xf32> to vector<8xf32>
      %18 = vector.shape_cast %17 : vector<8xf32> to vector<8x1xf32>
      %cst_12 = arith.constant dense<0.000000e+00> : vector<8xf32>
      %19 = vector.multi_reduction <add>, %16, %cst_12 [0] : vector<8x8xf32> to vector<8xf32>
      %20 = vector.shape_cast %19 : vector<8xf32> to vector<1x8xf32>
      %21 = vector.broadcast %18 : vector<8x1xf32> to vector<8x8xf32>
      %22 = vector.broadcast %20 : vector<1x8xf32> to vector<8x8xf32>
      %23 = arith.addf %21, %22 : vector<8x8xf32>
      %cst_13 = arith.constant 2.000000e+00 : f32
      %24 = vector.broadcast %cst_13 : f32 to vector<8x8xf32>
      %25 = arith.mulf %24, %11 : vector<8x8xf32>
      %26 = arith.subf %23, %25 : vector<8x8xf32>
      %cst_14 = arith.constant 9.99999996E-13 : f32
      %27 = vector.broadcast %cst_14 : f32 to vector<8x8xf32>
      %28 = arith.maximumf %26, %27 : vector<8x8xf32>
      %29 = math.sqrt %28 : vector<8x8xf32>
      %c0_15 = arith.constant 0 : index
      %c0_16 = arith.constant 0 : index
      %30 = vector.load %arg2[%c0_15, %c0_16] : memref<8x1xi32, #tpu.memory_space<vmem>>, vector<8x1xi32>
      %c0_17 = arith.constant 0 : index
      %c0_18 = arith.constant 0 : index
      %31 = vector.load %arg3[%c0_17, %c0_18] : memref<1x8xi32, #tpu.memory_space<vmem>>, vector<1x8xi32>
      %32 = vector.broadcast %30 : vector<8x1xi32> to vector<8x8xi32>
      %33 = vector.broadcast %31 : vector<1x8xi32> to vector<8x8xi32>
      %34 = arith.cmpi eq, %32, %33 : vector<8x8xi32>
      %c8_i32 = arith.constant 8 : i32
      %35 = vector.broadcast %c8_i32 : i32 to vector<8x8xi32>
      %36 = arith.cmpi slt, %13, %35 : vector<8x8xi32>
      %37 = arith.andi %34, %36 : vector<8x8xi1>
      %cst_19 = arith.constant dense<true> : vector<8x8xi1>
      %38 = arith.xori %34, %cst_19 : vector<8x8xi1>
      %39 = arith.andi %38, %36 : vector<8x8xi1>
      %cst_20 = arith.constant 0.000000e+00 : f32
      %cst_21 = arith.constant 1.000000e+30 : f32
      %40 = arith.subf %cst_20, %cst_21 : f32
      %41 = vector.broadcast %40 : f32 to vector<8x8xf32>
      %42 = arith.select %37, %29, %41 : vector<8x8xi1>, vector<8x8xf32>
      %cst_22 = arith.constant dense<0xFF800000> : vector<8xf32>
      %43 = vector.multi_reduction <maximumf>, %42, %cst_22 [1] : vector<8x8xf32> to vector<8xf32>
      %44 = vector.shape_cast %43 : vector<8xf32> to vector<8x1xf32>
      %cst_23 = arith.constant 1.000000e+30 : f32
      %45 = vector.broadcast %cst_23 : f32 to vector<8x8xf32>
      %46 = arith.select %39, %29, %45 : vector<8x8xi1>, vector<8x8xf32>
      %cst_24 = arith.constant dense<0x7F800000> : vector<8xf32>
      %47 = vector.multi_reduction <minimumf>, %46, %cst_24 [1] : vector<8x8xf32> to vector<8xf32>
      %48 = vector.shape_cast %47 : vector<8xf32> to vector<8x1xf32>
      %49 = tpu.iota {dimensions = array<i32: 0>} : vector<8x1xi32>
      %c8_i32_25 = arith.constant 8 : i32
      %50 = vector.broadcast %c8_i32_25 : i32 to vector<8x1xi32>
      %51 = arith.cmpi slt, %49, %50 : vector<8x1xi32>
      %52 = arith.subf %44, %48 : vector<8x1xf32>
      %cst_26 = arith.constant 3.000000e-01 : f32
      %53 = vector.broadcast %cst_26 : f32 to vector<8x1xf32>
      %54 = arith.addf %52, %53 : vector<8x1xf32>
      %cst_27 = arith.constant 0.000000e+00 : f32
      %55 = vector.broadcast %cst_27 : f32 to vector<8x1xf32>
      %56 = arith.maximumf %54, %55 : vector<8x1xf32>
      %cst_28 = arith.constant 0.000000e+00 : f32
      %57 = vector.broadcast %cst_28 : f32 to vector<8x1xf32>
      %58 = arith.select %51, %56, %57 : vector<8x1xi1>, vector<8x1xf32>
      %59 = vector.shape_cast %58 : vector<8x1xf32> to vector<1x8x1xf32>
      %cst_29 = arith.constant dense<0.000000e+00> : vector<1xf32>
      %60 = vector.multi_reduction <add>, %59, %cst_29 [1, 2] : vector<1x8x1xf32> to vector<1xf32>
      %61 = vector.shape_cast %60 : vector<1xf32> to vector<1x1x1xf32>
      %62 = vector.extract %61[0, 0, 0] : f32 from vector<1x1x1xf32>
      %cst_30 = arith.constant 1.250000e-01 : f32
      %63 = arith.mulf %62, %cst_30 : f32
      %64 = arith.cmpf oge, %48, %44 : vector<8x1xf32>
      %65 = arith.andi %51, %64 : vector<8x1xi1>
      %cst_31 = arith.constant 1.000000e+00 : f32
      %cst_32 = arith.constant 0.000000e+00 : f32
      %66 = vector.broadcast %cst_31 : f32 to vector<8x1xf32>
      %67 = vector.broadcast %cst_32 : f32 to vector<8x1xf32>
      %68 = arith.select %65, %66, %67 : vector<8x1xi1>, vector<8x1xf32>
      %69 = vector.shape_cast %68 : vector<8x1xf32> to vector<1x8x1xf32>
      %cst_33 = arith.constant dense<0.000000e+00> : vector<1xf32>
      %70 = vector.multi_reduction <add>, %69, %cst_33 [1, 2] : vector<1x8x1xf32> to vector<1xf32>
      %71 = vector.shape_cast %70 : vector<1xf32> to vector<1x1x1xf32>
      %72 = vector.extract %71[0, 0, 0] : f32 from vector<1x1x1xf32>
      %c0_34 = arith.constant 0 : index
      %c0_35 = arith.constant 0 : index
      %73 = memref.load %arg4[%c0_34, %c0_35] : memref<1x1xf32, #tpu.memory_space<smem>>
      memref.store %63, %arg4[%c0_34, %c0_35] : memref<1x1xf32, #tpu.memory_space<smem>>
      %74 = arith.fptosi %72 : f32 to i32
      %c0_36 = arith.constant 0 : index
      %c0_37 = arith.constant 0 : index
      %75 = memref.load %arg5[%c0_36, %c0_37] : memref<1x1xi32, #tpu.memory_space<smem>>
      memref.store %74, %arg5[%c0_36, %c0_37] : memref<1x1xi32, #tpu.memory_space<smem>>
    } else {
    }
    return
  }
  func.func @transform_0(%arg0: i32) -> (i32, i32) {
    %c0_i32 = arith.constant 0 : i32
    %c0_i32_0 = arith.constant 0 : i32
    return %c0_i32, %arg0 : i32, i32
  }
  func.func @transform_1(%arg0: i32) -> (i32, i32) {
    %c0_i32 = arith.constant 0 : i32
    %c0_i32_0 = arith.constant 0 : i32
    %c0_i32_1 = arith.constant 0 : i32
    return %c0_i32, %c0_i32_0 : i32, i32
  }
  func.func @transform_2(%arg0: i32) -> (i32, i32) {
    %c0_i32 = arith.constant 0 : i32
    %c0_i32_0 = arith.constant 0 : i32
    %c0_i32_1 = arith.constant 0 : i32
    return %c0_i32, %c0_i32_0 : i32, i32
  }
  func.func @transform_3(%arg0: i32) -> (i32, i32) {
    %c0_i32 = arith.constant 0 : i32
    %c0_i32_0 = arith.constant 0 : i32
    %c0_i32_1 = arith.constant 0 : i32
    return %c0_i32, %c0_i32_0 : i32, i32
  }
  func.func @transform_4(%arg0: i32) -> (i32, i32) {
    %c0_i32 = arith.constant 0 : i32
    %c0_i32_0 = arith.constant 0 : i32
    %c0_i32_1 = arith.constant 0 : i32
    return %c0_i32, %c0_i32_0 : i32, i32
  }
}

</mosaic_0001>

<bundles_post_ra>
// kernel: tpu_custom_call.1
= control target key start
LH: loop header
LB: loop body
LE: loop exit
PB: predicated region body
PF: predicated region fallthrough
CT: control target
= control target key end

     0   :  { %10 = vsyncpa [#allocation4], 0  ;;  %s761_s0 = inlined_call_operand.vmem [shape: f32[8,128], index: 0, kind: input, shape index: {}]   ;;  %s762_s1 = inlined_call_operand.vmem [shape: s32[8,1], index: 1, kind: input, shape index: {}]   ;;  %s763_s2 = inlined_call_operand.vmem [shape: s32[1,8], index: 2, kind: input, shape index: {}]   ;;  %s764_s3 = inlined_call_operand.hbm [shape: f32[1,1], index: 3, kind: output, shape index: {0}]   ;;  %s765_s4 = inlined_call_operand.hbm [shape: s32[1,1], index: 4, kind: output, shape index: {1}]  }
   0x1   :  { %v24_v0 = vld [vmem:[%s761_s0] sm:$0xff] }
   0x2   :  { %11 = vsyncpa [#allocation6], 0  ;;  %v672_v1 = vmov 0.0   ;;  %v27_v2 = vand.u32 4294901760, %v24_v0  ;;  %vm673_vm0 = vmmov 0   ;;  %vm22_vm1 = vcmask 64512  }
   0x3   :  { %600 = vmatprep.subr.mxu0 %v672_v1  ;;  %605 = vmatprep.subr.mxu1 %v672_v1  ;;  %23 = vst.msk [vmem:[#allocation2] sm:$0xff] %vm22_vm1, %v672_v1  ;;  %v674_v7 = vmov 0   ;;  %v479_v26 = vlaneseq  ;;  %v505_v33 = vld [vmem:[%s762_s1] sm:$0xff]  ;;  %vm675_vm5 = vmmov 1   ;;  %vm532_vm12 = vcmask 7168   ;;  %s648_s25 = scalar_lea.hbm %s764_s3, 16 }
   0x4   :  { %602 = vmatprep.mubr.msk.f32.mxu0 %vm673_vm0, %v672_v1  ;;  %607 = vmatprep.mubr.msk.f32.mxu1 %vm673_vm0, %v672_v1  ;;  %v93_v3 = vsub.f32 %v24_v0, %v27_v2  ;;  %v587_v45 = vld [vmem:[%s763_s2] ss:$0 sm:$0xff]  ;;  %p649_p1 = scmp.ne.s32.totalorder %s764_s3, %s648_s25  ;;  %p652_p2 = scmp.lt.u32.totalorder %s648_s25, %s764_s3 }
   0x5   :  { %601 = vmatpush3.xpose.msra.mxu0 %v27_v2  ;;  %645 = vset.pattern.permute.xlu0 %v674_v7  ;;  %v480_v28 = vshrl.u32 %v479_v26, 7  ;;  %v482_v29 = vand.u32 127, %v479_v26 }
   0x6   :  { %610 = vmatprep.subr.mxu0 %v672_v1  ;;  %v94_v4 = vand.u32 4294901760, %v93_v3  ;;  %p654_p3 = pnand %p652_p2, %p649_p1 }
   0x7   :  { %vm483_vm2 = vcmp.eq.s32.totalorder %v480_v28, %v482_v29  ;;  %vm515_vm4 = vcmp.lt.s32.totalorder %v482_v29, 8 }
   0x8   :  { %v95_v5 = vsub.f32 %v93_v3, %v94_v4 }
   0xa   :  { %v96_v6 = vand.u32 4294901760, %v95_v5  ;;  %v25_v22 = vld [vmem:[#allocation2] sm:$0xff] }
   0xc   :  { %606 = vmatpush3.xpose.msra.mxu1 %v96_v6  ;;  %603 = vmatmul.mubr.f32.vlgmr.msra.gmra.mrb[0].mxu0 %v96_v6 }
   0xd   :  { %611 = vmatpush3.xpose.msra.mxu0 %v93_v3  ;;  %615 = vmatprep.subr.mxu1 %v672_v1 }
   0xe   :  { %612 = vmatprep.mubr.msk.f32.mxu0 %vm673_vm0, %v672_v1  ;;  %620 = vmatprep.subr.mxu0 %v672_v1 }
   0xf   :  { %608 = vmatmul.mubr.f32.vlgmr.msra.gmra.mrb[0].mxu1 %v27_v2 }
  0x10   :  { %616 = vmatpush3.xpose.msra.mxu1 %v27_v2  ;;  %613 = vmatmul.mubr.f32.vlgmr.msra.gmra.mrb[2].mxu0 %v93_v3 }
  0x11   :  { %617 = vmatprep.mubr.msk.f32.mxu1 %vm673_vm0, %v672_v1  ;;  %621 = vmatpush3.xpose.msra.mxu0 %v94_v4 }
  0x12   :  { %625 = vmatprep.subr.mxu1 %v672_v1  ;;  %622 = vmatprep.mubr.msk.f32.mxu0 %vm673_vm0, %v672_v1 }
  0x13   :  { %618 = vmatmul.mubr.f32.vlgmr.msra.gmra.mrb[2].mxu1 %v94_v4 }
  0x14   :  { %626 = vmatpush3.xpose.msra.mxu1 %v27_v2  ;;  %623 = vmatmul.mubr.f32.vlgmr.msra.gmra.mrb[4].mxu0 %v27_v2 }
  0x15   :  { %627 = vmatprep.mubr.msk.f32.mxu1 %vm673_vm0, %v672_v1 }
  0x17   :  { %628 = vmatmul.mubr.f32.vlgmr.msra.gmra.mrb[4].mxu1 %v27_v2 }
  0xdf   :  { %v98_v8 = vpop.f32.mrb[0].mxu0 }
  0xe0   :  { %v604_v9 = vpop.f32.mrb[1].mxu0 }
  0xe2   :  { %v174_v10 = vpop.f32.mrb[0].mxu1 }
  0xe3   :  { %v175_v11 = vadd.f32 %v174_v10, %v98_v8  ;;  %v609_v12 = vpop.f32.mrb[1].mxu1  ;;  %v248_v13 = vpop.f32.mrb[2].mxu0 }
  0xe4   :  { %v614_v14 = vpop.f32.mrb[3].mxu0 }
  0xe5   :  { %v249_v15 = vadd.f32 %v248_v13, %v175_v11 }
  0xe6   :  { %v322_v16 = vpop.f32.mrb[2].mxu1 }
  0xe7   :  { %v323_v17 = vadd.f32 %v322_v16, %v249_v15  ;;  %v619_v18 = vpop.f32.mrb[3].mxu1  ;;  %v396_v19 = vpop.f32.mrb[4].mxu0 }
  0xe8   :  { %v624_v20 = vpop.f32.mrb[5].mxu0 }
  0xe9   :  { %v397_v21 = vadd.f32 %v396_v19, %v323_v17 }
  0xea   :  { %v468_v23 = vpop.f32.mrb[4].mxu1 }
  0xeb   :  { %v469_v24 = vadd.f32 %v468_v23, %v397_v21  ;;  %v629_v25 = vpop.f32.mrb[5].mxu1 }
  0xed   :  { %v472_v27 = vadd.f32 %v469_v24, %v25_v22 }
  0xef   :  { %474 = vst.msk [vmem:[#allocation2] sm:$0xff] %vm22_vm1, %v472_v27 }
  0xf6   :  { %v478_v30 = vld [vmem:[#allocation2] sm:$0xff] }
  0xf7   :  { %v484_v31 = vsel %vm483_vm2, %v478_v30, 0.0  ;;  %v495_v41 = vmul.f32 2.0, %v478_v30 }
  0xf8   :  { %v485_v32 = vsel %vm22_vm1, %v484_v31, 0.0 }
  0xf9   :  { %486 = vadd.xlane.f32.xlu0 %v485_v32  ;;  %v488_v34 = vrot.slane %v485_v32, 4 }
  0xfb   :  { %v489_v35 = vadd.f32 %v488_v34, %v485_v32 }
  0xfd   :  { %v490_v36 = vrot.slane %v489_v35, 2 }
  0xff   :  { %v491_v37 = vadd.f32 %v490_v36, %v489_v35 }
 0x101   :  { %v492_v38 = vrot.slane %v491_v37, 1 }
 0x103   :  { %v493_v39 = vadd.f32 %v492_v38, %v491_v37 }
 0x10f   :  { %508 = vperm.xlu0 %645, %v505_v33  }
 0x186   :  { %v487_v40 = vpop.xlane.xlu0 %486 }
 0x187   :  { %v494_v42 = vadd.f32 %v493_v39, %v487_v40 }
 0x189   :  { %v496_v43 = vsub.f32 %v494_v42, %v495_v41 }
 0x18b   :  { %v497_v44 = vmax.f32 %v496_v43, 1e-12 }
 0x18d   :  { %646 = vrsqrt.f32 %v497_v44  ;;  %vm500_vm8 = vcmp.eq.f32.partialorder %v497_v44, inf  ;;  %v503_v49 = vand.u32 2147483648, %v497_v44  ;;  %vm502_vm9 = vcmp.eq.f32.partialorder %v497_v44, 0.0 }
 0x18e   :  { %v509_v46 = vpop.permute.xlu0 %508 }
 0x18f   :  { %vm514_vm3 = vcmp.eq.s32.totalorder %v509_v46, %v587_v45 }
 0x190   :  { %vm517_vm6 = vmxor %vm514_vm3, %vm675_vm5 }
 0x191   :  { %vm516_vm7 = vmand %vm514_vm3, %vm515_vm4 }
 0x192   :  { %vm518_vm10 = vmand %vm517_vm6, %vm515_vm4 }
 0x197   :  { %v647_v47 = vpop.eup %646 }
 0x198   :  { %v499_v48 = vmul.f32 %v647_v47, %v497_v44 }
 0x19a   :  { %v501_v50 = vsel %vm500_vm8, %v497_v44, %v499_v48 }
 0x19b   :  { %v504_v51 = vsel %vm502_vm9, %v503_v49, %v501_v50 }
 0x19c   :  { %v519_v52 = vsel %vm516_vm7, %v504_v51, -1e+30  ;;  %v523_v54 = vsel %vm518_vm10, %v504_v51, 1e+30 }
 0x19d   :  { %v520_v53 = vsel %vm22_vm1, %v519_v52, -inf  ;;  %v524_v55 = vsel %vm22_vm1, %v523_v54, inf }
 0x19e   :  { %521 = vmax.xlane.f32.xlu1 %v520_v53 }
 0x1a2   :  { %525 = vmin.xlane.f32.xlu1 %v524_v55 }
 0x22b   :  { %v522_v56 = vpop.xlane.xlu1 %521 }
 0x22f   :  { %v526_v57 = vpop.xlane.xlu1 %525 }
 0x230   :  { %v528_v58 = vsub.f32 %v522_v56, %v526_v57  ;;  %vm544_vm11 = vcmp.ge.f32.partialorder %v526_v57, %v522_v56 }
 0x231   :  { %v546_v62 = vsel %vm544_vm11, 1.0, %v672_v1 }
 0x232   :  { %v529_v59 = vadd.f32 0.3, %v528_v58  ;;  %v547_v63 = vsel %vm532_vm12, %v546_v62, 0.0 }
 0x234   :  { %v530_v60 = vmax.f32 %v529_v59, 0.0 }
 0x236   :  { %v533_v61 = vsel %vm532_vm12, %v530_v60, 0.0 }
 0x237   :  { %534 = vadd.xlane.f32.xlu1 %v533_v61 }
 0x23b   :  { %548 = vadd.xlane.f32.xlu1 %v547_v63 }
 0x2c4   :  { %v535_v0 = vpop.xlane.xlu1 %534 }
 0x2c5   :  { %v536_v2 = vrot.slane %v535_v0, 4 }
 0x2c7   :  { %v537_v3 = vadd.f32 %v536_v2, %v535_v0 }
 0x2c8   :  { %v549_v4 = vpop.xlane.xlu1 %548 }
 0x2c9   :  { %v538_v5 = vrot.slane %v537_v3, 2  ;;  %v550_v6 = vrot.slane %v549_v4, 4 }
 0x2cb   :  { %v551_v7 = vadd.f32 %v550_v6, %v549_v4  ;;  %v539_v8 = vadd.f32 %v538_v5, %v537_v3 }
 0x2cd   :  { %v552_v9 = vrot.slane %v551_v7, 2  ;;  %v540_v10 = vrot.slane %v539_v8, 1 }
 0x2cf   :  { %v553_v11 = vadd.f32 %v552_v9, %v551_v7  ;;  %v541_v12 = vadd.f32 %v540_v10, %v539_v8 }
 0x2d1   :  { %630 = vpush %v541_v12  ;;  %v554_v13 = vrot.slane %v553_v11, 1 }
 0x2d3   :  { %v555_v14 = vadd.f32 %v554_v13, %v553_v11 }
 0x2d5   :  { %632 = vpush %v555_v14 }
 0x302   :  { %s631_s1 = spop %630 }
 0x303   :  { %s543_s2 = smul.f32 0.125, %s631_s1 }
 0x305   :  { %558 = sst [smem:[#allocation3]] %s543_s2 }
 0x306   :  { %s633_s20 = spop %632 }
 0x307   :  { %p634_p0 = scmp.lt.s32.totalorder %s633_s20, 0  ;;  %s635_s21 = sceil.f32 %s633_s20 }
 0x308   :  { %s636_s22 = sfloor.f32 %s633_s20 }
 0x309   :  { %657 = shalt.err (!%p654_p3)
}
 0x30a   :  { %s676_s30 = smov [#allocation3]   ;;  %s767_s21 = smov (!%p634_p0, %s635_s21), %s636_s22 }
 0x30b   :  { %569 = dma.smem_to_hbm %s676_s30, 16, %s764_s3, [#allocation4]  }
 0x30c   :  { %s638_s7 = scvt.f32.s32 %s767_s21  ;;  %s658_s10 = scalar_lea.hbm %s765_s4, 16 }
 0x30d   :  { %p659_p4 = scmp.ne.s32.totalorder %s765_s4, %s658_s10  ;;  %p662_p5 = scmp.lt.u32.totalorder %s658_s10, %s765_s4 }
 0x30e   :  { %561 = sst [smem:[#allocation5]] %s638_s7 }
 0x30f   :  { %p664_p6 = pnand %p662_p5, %p659_p4 }
 0x311   :  { %667 = shalt.err (!%p664_p6)
}
 0x312   :  { %s677_s15 = smov [#allocation5]  }
 0x313   :  { %577 = dma.smem_to_hbm %s677_s15, 16, %s765_s4, [#allocation6]  }
 0x314   :  { %668 = dma.done.wait [#allocation4], 16  }
 0x315   :  { %669 = vsyncadd [#allocation4], 4294967280 }
 0x316   :  { %670 = dma.done.wait [#allocation6], 16  }
 0x317   :  { %671 = vsyncadd [#allocation6], 4294967280 }
 0x318   :  { %584 = sfence }
 0x319   :  { %585 = vsyncpa [#allocation4], 1 }
 0x31a   :  { %586 = vsyncpa [#allocation6], 1 }

</bundles_post_ra>
